<compile_context>
chip_gen: v6e
topology: v6e:2x2x1
jax: 0.10.0
libtpu: 0.0.40
codegen_flags: <defaults>
</compile_context>

<pallas_src>
import functools

import numpy as np
import jax
import jax.numpy as jnp
from jax.experimental import pallas as pl
from jax.experimental.pallas import tpu as pltpu


_LANE = 128
_SUBLANE = 8
_PREF_ROWS = 4096            # target row tile (>= ~2 MiB per tile for Fp >= 128)


def _round_up(n, m):
    return ((n + m - 1) // m) * m


def _cdiv(a, b):
    return -(-a // b)


def _device_kind():
    try:
        return jax.devices()[0].device_kind.lower()
    except Exception:
        return ""


_KIND = _device_kind()
_IS_V7 = "v7" in _KIND
_OLD_GEN = ("v5" in _KIND) or ("v6" in _KIND)   # 128 MiB VMEM, 1 TensorCore
_NUM_TC = 2 if _IS_V7 else 1                    # 2-way core split only on v7x
# Unknown / v7x chips get the conservative 64-MiB-class budgets.
_VMEM_LIMIT = (96 << 20) if _OLD_GEN else (48 << 20)
_TILE_BUDGET = (24 << 20) if _OLD_GEN else (12 << 20)       # live double-buffered tiles
_RESIDENT_BUDGET = (80 << 20) if _OLD_GEN else (36 << 20)   # fused VMEM residency of x


def _pick_tb(batch, feat, n_bufs, tb=None):
    """Row-tile choice: large (amortizes per-step overhead), VMEM-budgeted,
    8-row aligned, or exactly the full batch (always a legal block shape)."""
    if tb is None:
        fp = _round_up(feat, _LANE)
        cap = (_TILE_BUDGET // (n_bufs * fp * 4)) // _SUBLANE * _SUBLANE
        tb = min(_PREF_ROWS, max(_SUBLANE, cap))
    if tb >= batch:
        return batch
    return max(_SUBLANE, (tb // _SUBLANE) * _SUBLANE)


def _fused_fits(batch, feat, dtype, tb):
    """Can the whole training step keep x resident in VMEM on this generation?"""
    fp = _round_up(feat, _LANE)
    tbp = _round_up(tb, _SUBLANE)
    nt = _cdiv(batch, tb)
    isz = np.dtype(dtype).itemsize
    resident = nt * tbp * fp * isz                 # x stash scratch
    stream = 2 * tbp * fp * isz * 2                # double-buffered x in + y out
    stream += 2 * tbp * _LANE * 4                  # mask blocks (lane padded)
    fixed = 4 * _SUBLANE * fp * 4 + (1 << 20)      # accumulators + slack
    return resident + stream + fixed <= _RESIDENT_BUDGET


# ---------------------------------------------------------------------------
# Shared in-kernel helpers
# ---------------------------------------------------------------------------

def _row_routing_lhs(tb):
    """(8, tb) 0/1 matrix routing row r to sublane r % 8 (MXU row reduction)."""
    sub = jax.lax.broadcasted_iota(jnp.int32, (_SUBLANE, tb), 0)
    col = jax.lax.broadcasted_iota(jnp.int32, (_SUBLANE, tb), 1)
    return jnp.where((col & (_SUBLANE - 1)) == sub, 1.0, 0.0).astype(jnp.float32)


def _masked_shifted(x_ref, mask_ref, mean_ref, row0, batch):
    """Returns mask*(x - running_mean) with tail rows beyond `batch` zeroed via
    select (not multiply), so garbage tail reads never poison the sums."""
    tb = x_ref.shape[0]
    xc = x_ref[...].astype(jnp.float32) - mean_ref[...]
    rows = jax.lax.broadcasted_iota(jnp.int32, (tb, 1), 0) + row0
    m = jnp.where(rows < batch, mask_ref[...], 0.0)        # (tb, 1)
    return jnp.where(m > 0.0, xc, 0.0)                     # (tb, F)


# ---------------------------------------------------------------------------
# Kernel 1 (unfused fallback): masked per-feature shifted sums
# ---------------------------------------------------------------------------

def _masked_stats_kernel(x_ref, mask_ref, mean_ref, sum_ref, sumsq_ref, *, batch):
    @pl.when(pl.program_id(1) == 0)
    def _init():
        sum_ref[...] = jnp.zeros_like(sum_ref)
        sumsq_ref[...] = jnp.zeros_like(sumsq_ref)

    tb = x_ref.shape[0]
    tile_idx = pl.program_id(0) * pl.num_programs(1) + pl.program_id(1)
    xm = _masked_shifted(x_ref, mask_ref, mean_ref, tile_idx * tb, batch)

    lhs = _row_routing_lhs(tb)
    sum_ref[...] += jnp.dot(lhs, xm, preferred_element_type=jnp.float32)
    sumsq_ref[...] += jnp.dot(lhs, xm * xm, preferred_element_type=jnp.float32)


def masked_stats(x, mask_col, mean, *, tb=None):
    """Per-feature masked sums of (x - mean) and (x - mean)^2, each shape (F,)."""
    B, F = x.shape
    tb = _pick_tb(B, F, n_bufs=3, tb=tb)
    tiles = _cdiv(B, tb)
    cores = max(1, min(_NUM_TC, tiles))
    tpc = _cdiv(tiles, cores)
    mean2 = mean.reshape(1, F).astype(jnp.float32)

    # Clamp phantom block indices (cores*tpc may exceed tiles); the in-kernel
    # row-validity mask zeroes their contribution, so nothing is double counted.
    def data_map(c, i):
        return (jnp.minimum(c * tpc + i, tiles - 1), 0)

    sums, sumsqs = pl.pallas_call(
        functools.partial(_masked_stats_kernel, batch=B),
        out_shape=(
            jax.ShapeDtypeStruct((_SUBLANE * cores, F), jnp.float32),
            jax.ShapeDtypeStruct((_SUBLANE * cores, F), jnp.float32),
        ),
        grid=(cores, tpc),
        in_specs=[
            pl.BlockSpec((tb, F), data_map),
            pl.BlockSpec((tb, 1), data_map),
            pl.BlockSpec((1, F), lambda c, i: (0, 0)),
        ],
        out_specs=(
            pl.BlockSpec((_SUBLANE, F), lambda c, i: (c, 0)),
            pl.BlockSpec((_SUBLANE, F), lambda c, i: (c, 0)),
        ),
        compiler_params=pltpu.CompilerParams(
            dimension_semantics=("parallel", "arbitrary"),
            vmem_limit_bytes=_VMEM_LIMIT,
        ),
    )(x, mask_col, mean2)
    return sums.sum(axis=0), sumsqs.sum(axis=0)


# ---------------------------------------------------------------------------
# Kernel 2 (unfused fallback / eval): normalize
# ---------------------------------------------------------------------------

def _normalize_kernel(x_ref, mean_ref, inv_ref, o_ref, *, clip):
    xf = x_ref[...].astype(jnp.float32)
    y = (xf - mean_ref[...]) * inv_ref[...]
    o_ref[...] = jnp.clip(y, -clip, clip).astype(o_ref.dtype)


def normalize(x, mean, inv_std, clip, *, tb=None):
    B, F = x.shape
    tb = _pick_tb(B, F, n_bufs=4, tb=tb)
    mean2 = mean.reshape(1, F).astype(jnp.float32)
    inv2 = inv_std.reshape(1, F).astype(jnp.float32)
    return pl.pallas_call(
        functools.partial(_normalize_kernel, clip=float(clip)),
        out_shape=jax.ShapeDtypeStruct((B, F), x.dtype),
        grid=(_cdiv(B, tb),),
        in_specs=[
            pl.BlockSpec((tb, F), lambda i: (i, 0)),
            pl.BlockSpec((1, F), lambda i: (0, 0)),
            pl.BlockSpec((1, F), lambda i: (0, 0)),
        ],
        out_specs=pl.BlockSpec((tb, F), lambda i: (i, 0)),
        compiler_params=pltpu.CompilerParams(
            dimension_semantics=("parallel",),
            vmem_limit_bytes=_VMEM_LIMIT,
        ),
    )(x, mean2, inv2)


# ---------------------------------------------------------------------------
# Welford merge with shifted sums (used by the unfused path; mirrored in-kernel)
# ---------------------------------------------------------------------------

def _merge_stats(count, mean, var, s1, s2, b_count):
    """s1 = sum(mask*(x-mean)), s2 = sum(mask*(x-mean)^2)."""
    safe_n = jnp.maximum(b_count, 1.0)
    delta = s1 / safe_n                              # batch_mean - running_mean
    # unbiased batch variance (torch.var correction=1); b_count<=1 -> 0, not NaN.
    batch_var = (s2 - safe_n * delta * delta) / jnp.maximum(b_count - 1.0, 1.0)
    total = count + b_count
    safe_total = jnp.maximum(total, 1.0)
    new_mean = mean + delta * b_count / safe_total
    m2 = var * count + batch_var * b_count + delta * delta * count * b_count / safe_total
    new_var = m2 / safe_total
    has_rows = b_count > 0.0                         # all-masked batch: keep stats unchanged
    return (jnp.where(has_rows, total, count),
            jnp.where(has_rows, new_mean, mean),
            jnp.where(has_rows, new_var, var))


# ---------------------------------------------------------------------------
# Fused training step: stats + merge + normalize, x read from HBM once
# ---------------------------------------------------------------------------

def _fused_kernel(x_ref, mask_ref, count_ref, bcount_ref, mean_ref, var_ref,
                  y_ref, ncount_ref, nmean_ref, nvar_ref,
                  xres, acc_s, accsq_s, mu_s, inv_s,
                  *, batch, clip, epsilon):
    phase = pl.program_id(0)
    tile = pl.program_id(1)
    nt = pl.num_programs(1)

    @pl.when(phase == 0)
    def _stats_phase():
        @pl.when(tile == 0)
        def _init():
            acc_s[...] = jnp.zeros_like(acc_s)
            accsq_s[...] = jnp.zeros_like(accsq_s)

        tb = x_ref.shape[0]
        xres[tile] = x_ref[...]                       # stash native-dtype tile for phase 1

        xm = _masked_shifted(x_ref, mask_ref, mean_ref, tile * tb, batch)
        lhs = _row_routing_lhs(tb)
        acc_s[...] += jnp.dot(lhs, xm, preferred_element_type=jnp.float32)
        accsq_s[...] += jnp.dot(lhs, xm * xm, preferred_element_type=jnp.float32)

        @pl.when(tile == nt - 1)
        def _merge():
            s1 = acc_s[...].sum(axis=0, keepdims=True)       # (1, F)
            s2 = accsq_s[...].sum(axis=0, keepdims=True)
            cnt = count_ref[...]                             # (1, 1)
            bc = bcount_ref[...]
            mean0 = mean_ref[...]
            var0 = var_ref[...]

            safe_n = jnp.maximum(bc, 1.0)
            delta = s1 / safe_n
            bvar = (s2 - safe_n * delta * delta) / jnp.maximum(bc - 1.0, 1.0)
            total = cnt + bc
            safe_total = jnp.maximum(total, 1.0)
            new_mean = mean0 + delta * bc / safe_total
            m2 = var0 * cnt + bvar * bc + delta * delta * cnt * bc / safe_total
            new_var = m2 / safe_total

            has = bc > 0.0
            new_mean = jnp.where(has, new_mean, mean0)
            new_var = jnp.where(has, new_var, var0)
            ncount_ref[...] = jnp.where(has, total, cnt)
            nmean_ref[...] = new_mean
            nvar_ref[...] = new_var
            mu_s[...] = new_mean
            inv_s[...] = jax.lax.rsqrt(new_var + epsilon)

    @pl.when(phase == 1)
    def _norm_phase():
        xf = xres[tile].astype(jnp.float32)
        y = (xf - mu_s[...]) * inv_s[...]
        y_ref[...] = jnp.clip(y, -clip, clip).astype(y_ref.dtype)


def _fused_train_step(count, mean, var, x, mask_col, clip, epsilon, tb):
    B, F = x.shape
    nt = _cdiv(B, tb)
    count2 = count.reshape(1, 1).astype(jnp.float32)
    bcount2 = jnp.sum(mask_col).reshape(1, 1)
    mean2 = mean.reshape(1, F).astype(jnp.float32)
    var2 = var.reshape(1, F).astype(jnp.float32)

    y, ncount, nmean, nvar = pl.pallas_call(
        functools.partial(_fused_kernel, batch=B, clip=float(clip),
                          epsilon=float(epsilon)),
        out_shape=(
            jax.ShapeDtypeStruct((B, F), x.dtype),
            jax.ShapeDtypeStruct((1, 1), jnp.float32),
            jax.ShapeDtypeStruct((1, F), jnp.float32),
            jax.ShapeDtypeStruct((1, F), jnp.float32),
        ),
        grid=(2, nt),   # phase 0: stats + merge, phase 1: normalize resident tiles
        in_specs=[
            pl.BlockSpec((tb, F), lambda p, i: (i * (1 - p), 0)),
            pl.BlockSpec((tb, 1), lambda p, i: (i * (1 - p), 0)),
            pl.BlockSpec((1, 1), lambda p, i: (0, 0)),
            pl.BlockSpec((1, 1), lambda p, i: (0, 0)),
            pl.BlockSpec((1, F), lambda p, i: (0, 0)),
            pl.BlockSpec((1, F), lambda p, i: (0, 0)),
        ],
        out_specs=(
            pl.BlockSpec((tb, F), lambda p, i: (i * p, 0)),
            pl.BlockSpec((1, 1), lambda p, i: (0, 0)),
            pl.BlockSpec((1, F), lambda p, i: (0, 0)),
            pl.BlockSpec((1, F), lambda p, i: (0, 0)),
        ),
        scratch_shapes=[
            pltpu.VMEM((nt, tb, F), x.dtype),            # resident copy of x
            pltpu.VMEM((_SUBLANE, F), jnp.float32),      # sum accumulator
            pltpu.VMEM((_SUBLANE, F), jnp.float32),      # sumsq accumulator
            pltpu.VMEM((1, F), jnp.float32),             # merged mean
            pltpu.VMEM((1, F), jnp.float32),             # merged inv_std
        ],
        compiler_params=pltpu.CompilerParams(
            dimension_semantics=("arbitrary", "arbitrary"),
            vmem_limit_bytes=_VMEM_LIMIT,
        ),
    )(x, mask_col, count2, bcount2, mean2, var2)
    return ncount.reshape(()), nmean.reshape((F,)), nvar.reshape((F,)), y


# ---------------------------------------------------------------------------
# One jitted XLA program per step (stats + merge + rsqrt + normalize)
# ---------------------------------------------------------------------------

@functools.partial(jax.jit, static_argnames=("clip", "epsilon", "training",
                                             "allow_fused", "tile_rows"))
def _running_norm_step(count, mean, var, x, mask, *, clip, epsilon, training,
                       allow_fused, tile_rows):
    B, F = x.shape
    if not training:
        inv_std = jax.lax.rsqrt(var + epsilon)
        return count, mean, var, normalize(x, mean, inv_std, clip, tb=tile_rows)

    mask_col = mask.astype(jnp.float32).reshape(B, 1)
    tb = _pick_tb(B, F, n_bufs=4, tb=tile_rows)
    if allow_fused and _fused_fits(B, F, x.dtype, tb):
        return _fused_train_step(count, mean, var, x, mask_col, clip, epsilon, tb)

    # Unfused fallback (x larger than the VMEM residency budget): two passes.
    s1, s2 = masked_stats(x, mask_col, mean, tb=tile_rows)
    b_count = jnp.sum(mask_col)
    count, mean, var = _merge_stats(count, mean, var, s1, s2, b_count)
    inv_std = jax.lax.rsqrt(var + epsilon)
    return count, mean, var, normalize(x, mean, inv_std, clip, tb=tile_rows)


@functools.partial(jax.jit, static_argnames=("tile_rows",))
def _update_stats(count, mean, var, x, mask, *, tile_rows):
    B, F = x.shape
    mask_col = mask.astype(jnp.float32).reshape(B, 1)
    s1, s2 = masked_stats(x, mask_col, mean, tb=tile_rows)
    return _merge_stats(count, mean, var, s1, s2, jnp.sum(mask_col))


class RunningNorm:
    """num_features mode of the torch RunningNorm.

    count/mean/var live on device in float32 (TPU has no f64; the count is
    exact up to 2^24 accumulated rows).  Shifted sums keep the batch-variance
    computation well conditioned despite the f32 buffers.
    """
    # TODO(synk): feature_indexes gather/scatter path not implemented.

    def __init__(self, num_features, clip=10.0, epsilon=1e-8, *,
                 allow_fused=True, tile_rows=None):
        self.clip = float(clip)
        self.epsilon = float(epsilon)
        self.allow_fused = bool(allow_fused)
        self.tile_rows = tile_rows
        self.count = jnp.zeros((), jnp.float32)
        self.mean = jnp.zeros((num_features,), jnp.float32)
        self.var = jnp.ones((num_features,), jnp.float32)
        self.training = True

    def update(self, x, mask):
        self.count, self.mean, self.var = _update_stats(
            self.count, self.mean, self.var, x, jnp.asarray(mask),
            tile_rows=self.tile_rows)

    def __call__(self, x, mask):
        self.count, self.mean, self.var, y = _running_norm_step(
            self.count, self.mean, self.var, x, jnp.asarray(mask),
            clip=self.clip, epsilon=self.epsilon, training=self.training,
            allow_fused=self.allow_fused, tile_rows=self.tile_rows)
        return y


if __name__ == "__main__":
    B, F = 20, 32   # B deliberately not a multiple of 8: exercises tail masking
    key = jax.random.PRNGKey(0)
    k1, k2 = jax.random.split(key)
    x1 = jax.random.normal(k1, (B, F), dtype=jnp.float32) * 3.0 + 1.5
    x2 = jax.random.normal(k2, (B, F), dtype=jnp.float32) * 0.5 - 2.0
    mask1 = (jnp.arange(B) % 3) != 0
    mask2 = (jnp.arange(B) % 4) != 1

    # ----- pure-numpy float64 reference of the torch module -----
    def ref_steps(xs, ms, clip, eps):
        c, mean, var = 0.0, np.zeros(F, np.float64), np.ones(F, np.float64)
        outs = []
        for xv, mv in zip(xs, ms):
            mx = xv[mv]
            bc = mx.shape[0]
            bm = mx.mean(axis=0).astype(np.float64)
            bv = mx.var(axis=0, ddof=1).astype(np.float64)
            delta = bm - mean
            total = c + bc
            mean = mean + delta * bc / total
            m2 = var * c + bv * bc + delta ** 2 * c * bc / total
            var = m2 / total
            c = total
            outs.append(np.clip(
                (xv - mean.astype(np.float32)) / np.sqrt(var.astype(np.float32) + eps),
                -clip, clip))
        return outs

    xs_np = [np.asarray(x1), np.asarray(x2)]
    ms_np = [np.asarray(mask1), np.asarray(mask2)]
    y_ref = ref_steps(xs_np, ms_np, 10.0, 1e-8)

    # exercise the fused, unfused and auto-tiled (single full block) paths
    configs = {
        "fused": dict(allow_fused=True, tile_rows=8),
        "unfused": dict(allow_fused=False, tile_rows=8),
        "auto": dict(allow_fused=True, tile_rows=None),
    }
    for name, cfg in configs.items():
        rn = RunningNorm(num_features=F, clip=10.0, epsilon=1e-8, **cfg)
        y1 = rn(x1, mask1)
        y2 = jax.block_until_ready(rn(x2, mask2))
        np.testing.assert_allclose(np.asarray(y1), y_ref[0], rtol=1e-4, atol=1e-4,
                                   err_msg=f"{name}: step 1 mismatch")
        np.testing.assert_allclose(np.asarray(y2), y_ref[1], rtol=1e-4, atol=1e-4,
                                   err_msg=f"{name}: step 2 mismatch")

    # eval-mode path (normalize only, initial stats)
    rn_eval = RunningNorm(num_features=F)
    rn_eval.training = False
    y_eval = jax.block_until_ready(rn_eval(x1, mask1))
    np.testing.assert_allclose(np.asarray(y_eval),
                               np.clip(xs_np[0] / np.sqrt(1.0 + 1e-8), -10.0, 10.0),
                               rtol=1e-5, atol=1e-5)

    print("KERNEL_OK")
</pallas_src>

<mosaic_0001>
module attributes {stable_mosaic.version = 11 : i64} {
  func.func @_fused_kernel(%arg0: i32, %arg1: i32, %arg2: memref<8x32xf32, #tpu.memory_space<vmem>>, %arg3: memref<8x1xf32, #tpu.memory_space<vmem>>, %arg4: memref<1x1xf32, #tpu.memory_space<vmem>>, %arg5: memref<1x1xf32, #tpu.memory_space<vmem>>, %arg6: memref<1x32xf32, #tpu.memory_space<vmem>>, %arg7: memref<1x32xf32, #tpu.memory_space<vmem>>, %arg8: memref<8x32xf32, #tpu.memory_space<vmem>>, %arg9: memref<1x1xf32, #tpu.memory_space<vmem>>, %arg10: memref<1x32xf32, #tpu.memory_space<vmem>>, %arg11: memref<1x32xf32, #tpu.memory_space<vmem>>, %arg12: memref<3x8x32xf32, #tpu.memory_space<vmem>>, %arg13: memref<8x32xf32, #tpu.memory_space<vmem>>, %arg14: memref<8x32xf32, #tpu.memory_space<vmem>>, %arg15: memref<1x32xf32, #tpu.memory_space<vmem>>, %arg16: memref<1x32xf32, #tpu.memory_space<vmem>>) attributes {dimension_semantics = [#tpu.dimension_semantics<arbitrary>, #tpu.dimension_semantics<arbitrary>], iteration_bounds = array<i64: 2, 3>, scalar_prefetch = 0 : i64, scratch_operands = 5 : i64, tpu.core_type = #tpu.core_type<tc>, window_params = [{transform_indices = @transform_0, window_bounds = array<i64: 8, 32>}, {transform_indices = @transform_1, window_bounds = array<i64: 8, 1>}, {pipeline_mode = #tpu.pipeline_mode<synchronous>, transform_indices = @transform_2, window_bounds = array<i64: 1, 1>}, {pipeline_mode = #tpu.pipeline_mode<synchronous>, transform_indices = @transform_3, window_bounds = array<i64: 1, 1>}, {pipeline_mode = #tpu.pipeline_mode<synchronous>, transform_indices = @transform_4, window_bounds = array<i64: 1, 32>}, {pipeline_mode = #tpu.pipeline_mode<synchronous>, transform_indices = @transform_5, window_bounds = array<i64: 1, 32>}, {transform_indices = @transform_6, window_bounds = array<i64: 8, 32>}, {pipeline_mode = #tpu.pipeline_mode<synchronous>, transform_indices = @transform_7, window_bounds = array<i64: 1, 1>}, {pipeline_mode = #tpu.pipeline_mode<synchronous>, transform_indices = @transform_8, window_bounds = array<i64: 1, 32>}, {pipeline_mode = #tpu.pipeline_mode<synchronous>, transform_indices = @transform_9, window_bounds = array<i64: 1, 32>}]} {
    %c0_i32 = arith.constant 0 : i32
    %0 = arith.cmpi eq, %arg0, %c0_i32 : i32
    %1 = arith.extui %0 : i1 to i32
    %c0_i32_0 = arith.constant 0 : i32
    %2 = arith.cmpi ne, %1, %c0_i32_0 : i32
    scf.if %2 {
      %c0_i32_2 = arith.constant 0 : i32
      %6 = arith.cmpi eq, %arg1, %c0_i32_2 : i32
      %7 = arith.extui %6 : i1 to i32
      %c0_i32_3 = arith.constant 0 : i32
      %8 = arith.cmpi ne, %7, %c0_i32_3 : i32
      scf.if %8 {
        %cst_28 = arith.constant 0.000000e+00 : f32
        %53 = vector.broadcast %cst_28 : f32 to vector<8x32xf32>
        %c0_29 = arith.constant 0 : index
        %c0_30 = arith.constant 0 : index
        %54 = vector.load %arg13[%c0_29, %c0_30] : memref<8x32xf32, #tpu.memory_space<vmem>>, vector<8x32xf32>
        tpu.vector_store %arg13[%c0_29, %c0_30], %53 {strides = array<i32>} : memref<8x32xf32, #tpu.memory_space<vmem>>, vector<8x32xf32>,
        %cst_31 = arith.constant 0.000000e+00 : f32
        %55 = vector.broadcast %cst_31 : f32 to vector<8x32xf32>
        %c0_32 = arith.constant 0 : index
        %c0_33 = arith.constant 0 : index
        %56 = vector.load %arg14[%c0_32, %c0_33] : memref<8x32xf32, #tpu.memory_space<vmem>>, vector<8x32xf32>
        tpu.vector_store %arg14[%c0_32, %c0_33], %55 {strides = array<i32>} : memref<8x32xf32, #tpu.memory_space<vmem>>, vector<8x32xf32>,
      } else {
      }
      %c0 = arith.constant 0 : index
      %c0_4 = arith.constant 0 : index
      %9 = vector.load %arg2[%c0, %c0_4] : memref<8x32xf32, #tpu.memory_space<vmem>>, vector<8x32xf32>
      %10 = arith.index_cast %arg1 : i32 to index
      %c0_5 = arith.constant 0 : index
      %c0_6 = arith.constant 0 : index
      %11 = vector.load %arg12[%10, %c0_5, %c0_6] : memref<3x8x32xf32, #tpu.memory_space<vmem>>, vector<1x8x32xf32>
      %12 = vector.shape_cast %11 : vector<1x8x32xf32> to vector<8x32xf32>
      %13 = vector.shape_cast %9 : vector<8x32xf32> to vector<1x8x32xf32>
      tpu.vector_store %arg12[%10, %c0_5, %c0_6], %13 {strides = array<i32>} : memref<3x8x32xf32, #tpu.memory_space<vmem>>, vector<1x8x32xf32>,
      %c8_i32 = arith.constant 8 : i32
      %14 = arith.muli %arg1, %c8_i32 : i32
      %c0_7 = arith.constant 0 : index
      %c0_8 = arith.constant 0 : index
      %15 = vector.load %arg2[%c0_7, %c0_8] : memref<8x32xf32, #tpu.memory_space<vmem>>, vector<8x32xf32>
      %c0_9 = arith.constant 0 : index
      %c0_10 = arith.constant 0 : index
      %16 = vector.load %arg6[%c0_9, %c0_10] : memref<1x32xf32, #tpu.memory_space<vmem>>, vector<1x32xf32>
      %17 = vector.broadcast %16 : vector<1x32xf32> to vector<8x32xf32>
      %18 = arith.subf %15, %17 : vector<8x32xf32>
      %19 = tpu.iota {dimensions = array<i32: 0>} : vector<8x1xi32>
      %20 = vector.broadcast %14 : i32 to vector<8x1xi32>
      %21 = arith.addi %19, %20 : vector<8x1xi32>
      %c20_i32 = arith.constant 20 : i32
      %22 = vector.broadcast %c20_i32 : i32 to vector<8x1xi32>
      %23 = arith.cmpi slt, %21, %22 : vector<8x1xi32>
      %c0_11 = arith.constant 0 : index
      %c0_12 = arith.constant 0 : index
      %24 = vector.load %arg3[%c0_11, %c0_12] : memref<8x1xf32, #tpu.memory_space<vmem>>, vector<8x1xf32>
      %cst = arith.constant 0.000000e+00 : f32
      %25 = vector.broadcast %cst : f32 to vector<8x1xf32>
      %26 = arith.select %23, %24, %25 : vector<8x1xi1>, vector<8x1xf32>
      %cst_13 = arith.constant 0.000000e+00 : f32
      %27 = vector.broadcast %cst_13 : f32 to vector<8x1xf32>
      %28 = arith.cmpf ogt, %26, %27 : vector<8x1xf32>
      %cst_14 = arith.constant 0.000000e+00 : f32
      %29 = vector.shape_cast %28 : vector<8x1xi1> to vector<8x1xi1>
      %30 = vector.broadcast %29 : vector<8x1xi1> to vector<8x32xi1>
      %31 = vector.broadcast %cst_14 : f32 to vector<8x32xf32>
      %32 = arith.select %30, %18, %31 : vector<8x32xi1>, vector<8x32xf32>
      %33 = tpu.iota {dimensions = array<i32: 0>} : vector<8x8xi32>
      %34 = tpu.iota {dimensions = array<i32: 1>} : vector<8x8xi32>
      %c7_i32 = arith.constant 7 : i32
      %35 = vector.broadcast %c7_i32 : i32 to vector<8x8xi32>
      %36 = arith.andi %34, %35 : vector<8x8xi32>
      %37 = arith.cmpi eq, %36, %33 : vector<8x8xi32>
      %cst_15 = arith.constant 1.000000e+00 : f32
      %cst_16 = arith.constant 0.000000e+00 : f32
      %38 = vector.broadcast %cst_15 : f32 to vector<8x8xf32>
      %39 = vector.broadcast %cst_16 : f32 to vector<8x8xf32>
      %40 = arith.select %37, %38, %39 : vector<8x8xi1>, vector<8x8xf32>
      %c0_17 = arith.constant 0 : index
      %c0_18 = arith.constant 0 : index
      %41 = vector.load %arg13[%c0_17, %c0_18] : memref<8x32xf32, #tpu.memory_space<vmem>>, vector<8x32xf32>
      %cst_19 = arith.constant dense<0.000000e+00> : vector<8x32xf32>
      %42 = tpu.matmul %40, %32, %cst_19 {dimension_numbers = #tpu.dot_dimension_numbers<[1], [0], [0], [1], [0, 0, 1, 1], [], []>} : vector<8x8xf32>, vector<8x32xf32>, vector<8x32xf32> -> vector<8x32xf32>
      %43 = arith.addf %41, %42 : vector<8x32xf32>
      %c0_20 = arith.constant 0 : index
      %c0_21 = arith.constant 0 : index
      %44 = vector.load %arg13[%c0_20, %c0_21] : memref<8x32xf32, #tpu.memory_space<vmem>>, vector<8x32xf32>
      tpu.vector_store %arg13[%c0_20, %c0_21], %43 {strides = array<i32>} : memref<8x32xf32, #tpu.memory_space<vmem>>, vector<8x32xf32>,
      %c0_22 = arith.constant 0 : index
      %c0_23 = arith.constant 0 : index
      %45 = vector.load %arg14[%c0_22, %c0_23] : memref<8x32xf32, #tpu.memory_space<vmem>>, vector<8x32xf32>
      %46 = arith.mulf %32, %32 : vector<8x32xf32>
      %cst_24 = arith.constant dense<0.000000e+00> : vector<8x32xf32>
      %47 = tpu.matmul %40, %46, %cst_24 {dimension_numbers = #tpu.dot_dimension_numbers<[1], [0], [0], [1], [0, 0, 1, 1], [], []>} : vector<8x8xf32>, vector<8x32xf32>, vector<8x32xf32> -> vector<8x32xf32>
      %48 = arith.addf %45, %47 : vector<8x32xf32>
      %c0_25 = arith.constant 0 : index
      %c0_26 = arith.constant 0 : index
      %49 = vector.load %arg14[%c0_25, %c0_26] : memref<8x32xf32, #tpu.memory_space<vmem>>, vector<8x32xf32>
      tpu.vector_store %arg14[%c0_25, %c0_26], %48 {strides = array<i32>} : memref<8x32xf32, #tpu.memory_space<vmem>>, vector<8x32xf32>,
      %c2_i32 = arith.constant 2 : i32
      %50 = arith.cmpi eq, %arg1, %c2_i32 : i32
      %51 = arith.extui %50 : i1 to i32
      %c0_i32_27 = arith.constant 0 : i32
      %52 = arith.cmpi ne, %51, %c0_i32_27 : i32
      scf.if %52 {
        %c0_28 = arith.constant 0 : index
        %c0_29 = arith.constant 0 : index
        %53 = vector.load %arg13[%c0_28, %c0_29] : memref<8x32xf32, #tpu.memory_space<vmem>>, vector<8x32xf32>
        %cst_30 = arith.constant dense<0.000000e+00> : vector<32xf32>
        %54 = vector.multi_reduction <add>, %53, %cst_30 [0] : vector<8x32xf32> to vector<32xf32>
        %55 = vector.shape_cast %54 : vector<32xf32> to vector<1x32xf32>
        %c0_31 = arith.constant 0 : index
        %c0_32 = arith.constant 0 : index
        %56 = vector.load %arg14[%c0_31, %c0_32] : memref<8x32xf32, #tpu.memory_space<vmem>>, vector<8x32xf32>
        %cst_33 = arith.constant dense<0.000000e+00> : vector<32xf32>
        %57 = vector.multi_reduction <add>, %56, %cst_33 [0] : vector<8x32xf32> to vector<32xf32>
        %58 = vector.shape_cast %57 : vector<32xf32> to vector<1x32xf32>
        %c0_34 = arith.constant 0 : index
        %c0_35 = arith.constant 0 : index
        %59 = vector.load %arg4[%c0_34, %c0_35] : memref<1x1xf32, #tpu.memory_space<vmem>>, vector<1x1xf32>
        %c0_36 = arith.constant 0 : index
        %c0_37 = arith.constant 0 : index
        %60 = vector.load %arg5[%c0_36, %c0_37] : memref<1x1xf32, #tpu.memory_space<vmem>>, vector<1x1xf32>
        %c0_38 = arith.constant 0 : index
        %c0_39 = arith.constant 0 : index
        %61 = vector.load %arg6[%c0_38, %c0_39] : memref<1x32xf32, #tpu.memory_space<vmem>>, vector<1x32xf32>
        %c0_40 = arith.constant 0 : index
        %c0_41 = arith.constant 0 : index
        %62 = vector.load %arg7[%c0_40, %c0_41] : memref<1x32xf32, #tpu.memory_space<vmem>>, vector<1x32xf32>
        %cst_42 = arith.constant 1.000000e+00 : f32
        %63 = vector.broadcast %cst_42 : f32 to vector<1x1xf32>
        %64 = arith.maximumf %60, %63 : vector<1x1xf32>
        %65 = vector.broadcast %64 : vector<1x1xf32> to vector<1x32xf32>
        %66 = arith.divf %55, %65 : vector<1x32xf32>
        %67 = vector.broadcast %64 : vector<1x1xf32> to vector<1x32xf32>
        %68 = arith.mulf %67, %66 : vector<1x32xf32>
        %69 = arith.mulf %68, %66 : vector<1x32xf32>
        %70 = arith.subf %58, %69 : vector<1x32xf32>
        %cst_43 = arith.constant 1.000000e+00 : f32
        %71 = vector.broadcast %cst_43 : f32 to vector<1x1xf32>
        %72 = arith.subf %60, %71 : vector<1x1xf32>
        %cst_44 = arith.constant 1.000000e+00 : f32
        %73 = vector.broadcast %cst_44 : f32 to vector<1x1xf32>
        %74 = arith.maximumf %72, %73 : vector<1x1xf32>
        %75 = vector.broadcast %74 : vector<1x1xf32> to vector<1x32xf32>
        %76 = arith.divf %70, %75 : vector<1x32xf32>
        %77 = arith.addf %59, %60 : vector<1x1xf32>
        %cst_45 = arith.constant 1.000000e+00 : f32
        %78 = vector.broadcast %cst_45 : f32 to vector<1x1xf32>
        %79 = arith.maximumf %77, %78 : vector<1x1xf32>
        %80 = vector.broadcast %60 : vector<1x1xf32> to vector<1x32xf32>
        %81 = arith.mulf %66, %80 : vector<1x32xf32>
        %82 = vector.broadcast %79 : vector<1x1xf32> to vector<1x32xf32>
        %83 = arith.divf %81, %82 : vector<1x32xf32>
        %84 = arith.addf %61, %83 : vector<1x32xf32>
        %85 = vector.broadcast %59 : vector<1x1xf32> to vector<1x32xf32>
        %86 = arith.mulf %62, %85 : vector<1x32xf32>
        %87 = vector.broadcast %60 : vector<1x1xf32> to vector<1x32xf32>
        %88 = arith.mulf %76, %87 : vector<1x32xf32>
        %89 = arith.addf %86, %88 : vector<1x32xf32>
        %90 = arith.mulf %66, %66 : vector<1x32xf32>
        %91 = vector.broadcast %59 : vector<1x1xf32> to vector<1x32xf32>
        %92 = arith.mulf %90, %91 : vector<1x32xf32>
        %93 = vector.broadcast %60 : vector<1x1xf32> to vector<1x32xf32>
        %94 = arith.mulf %92, %93 : vector<1x32xf32>
        %95 = vector.broadcast %79 : vector<1x1xf32> to vector<1x32xf32>
        %96 = arith.divf %94, %95 : vector<1x32xf32>
        %97 = arith.addf %89, %96 : vector<1x32xf32>
        %98 = vector.broadcast %79 : vector<1x1xf32> to vector<1x32xf32>
        %99 = arith.divf %97, %98 : vector<1x32xf32>
        %cst_46 = arith.constant 0.000000e+00 : f32
        %100 = vector.broadcast %cst_46 : f32 to vector<1x1xf32>
        %101 = arith.cmpf ogt, %60, %100 : vector<1x1xf32>
        %102 = vector.shape_cast %101 : vector<1x1xi1> to vector<1x1xi1>
        %103 = vector.broadcast %102 : vector<1x1xi1> to vector<1x32xi1>
        %104 = arith.select %103, %84, %61 : vector<1x32xi1>, vector<1x32xf32>
        %105 = vector.shape_cast %101 : vector<1x1xi1> to vector<1x1xi1>
        %106 = vector.broadcast %105 : vector<1x1xi1> to vector<1x32xi1>
        %107 = arith.select %106, %99, %62 : vector<1x32xi1>, vector<1x32xf32>
        %108 = arith.select %101, %77, %59 : vector<1x1xi1>, vector<1x1xf32>
        %c0_47 = arith.constant 0 : index
        %c0_48 = arith.constant 0 : index
        %109 = vector.load %arg9[%c0_47, %c0_48] : memref<1x1xf32, #tpu.memory_space<vmem>>, vector<1x1xf32>
        tpu.vector_store %arg9[%c0_47, %c0_48], %108 {strides = array<i32>} : memref<1x1xf32, #tpu.memory_space<vmem>>, vector<1x1xf32>,
        %c0_49 = arith.constant 0 : index
        %c0_50 = arith.constant 0 : index
        %110 = vector.load %arg10[%c0_49, %c0_50] : memref<1x32xf32, #tpu.memory_space<vmem>>, vector<1x32xf32>
        tpu.vector_store %arg10[%c0_49, %c0_50], %104 {strides = array<i32>} : memref<1x32xf32, #tpu.memory_space<vmem>>, vector<1x32xf32>,
        %c0_51 = arith.constant 0 : index
        %c0_52 = arith.constant 0 : index
        %111 = vector.load %arg11[%c0_51, %c0_52] : memref<1x32xf32, #tpu.memory_space<vmem>>, vector<1x32xf32>
        tpu.vector_store %arg11[%c0_51, %c0_52], %107 {strides = array<i32>} : memref<1x32xf32, #tpu.memory_space<vmem>>, vector<1x32xf32>,
        %c0_53 = arith.constant 0 : index
        %c0_54 = arith.constant 0 : index
        %112 = vector.load %arg15[%c0_53, %c0_54] : memref<1x32xf32, #tpu.memory_space<vmem>>, vector<1x32xf32>
        tpu.vector_store %arg15[%c0_53, %c0_54], %104 {strides = array<i32>} : memref<1x32xf32, #tpu.memory_space<vmem>>, vector<1x32xf32>,
        %cst_55 = arith.constant 9.99999993E-9 : f32
        %113 = vector.broadcast %cst_55 : f32 to vector<1x32xf32>
        %114 = arith.addf %107, %113 : vector<1x32xf32>
        %115 = math.rsqrt %114 : vector<1x32xf32>
        %c0_56 = arith.constant 0 : index
        %c0_57 = arith.constant 0 : index
        %116 = vector.load %arg16[%c0_56, %c0_57] : memref<1x32xf32, #tpu.memory_space<vmem>>, vector<1x32xf32>
        tpu.vector_store %arg16[%c0_56, %c0_57], %115 {strides = array<i32>} : memref<1x32xf32, #tpu.memory_space<vmem>>, vector<1x32xf32>,
      } else {
      }
    } else {
    }
    %c1_i32 = arith.constant 1 : i32
    %3 = arith.cmpi eq, %arg0, %c1_i32 : i32
    %4 = arith.extui %3 : i1 to i32
    %c0_i32_1 = arith.constant 0 : i32
    %5 = arith.cmpi ne, %4, %c0_i32_1 : i32
    scf.if %5 {
      %6 = arith.index_cast %arg1 : i32 to index
      %c0 = arith.constant 0 : index
      %c0_2 = arith.constant 0 : index
      %7 = vector.load %arg12[%6, %c0, %c0_2] : memref<3x8x32xf32, #tpu.memory_space<vmem>>, vector<1x8x32xf32>
      %8 = vector.shape_cast %7 : vector<1x8x32xf32> to vector<8x32xf32>
      %c0_3 = arith.constant 0 : index
      %c0_4 = arith.constant 0 : index
      %9 = vector.load %arg15[%c0_3, %c0_4] : memref<1x32xf32, #tpu.memory_space<vmem>>, vector<1x32xf32>
      %10 = vector.broadcast %9 : vector<1x32xf32> to vector<8x32xf32>
      %11 = arith.subf %8, %10 : vector<8x32xf32>
      %c0_5 = arith.constant 0 : index
      %c0_6 = arith.constant 0 : index
      %12 = vector.load %arg16[%c0_5, %c0_6] : memref<1x32xf32, #tpu.memory_space<vmem>>, vector<1x32xf32>
      %13 = vector.broadcast %12 : vector<1x32xf32> to vector<8x32xf32>
      %14 = arith.mulf %11, %13 : vector<8x32xf32>
      %cst = arith.constant -1.000000e+01 : f32
      %cst_7 = arith.constant 1.000000e+01 : f32
      %15 = vector.broadcast %cst : f32 to vector<8x32xf32>
      %16 = arith.maximumf %15, %14 : vector<8x32xf32>
      %17 = vector.broadcast %cst_7 : f32 to vector<8x32xf32>
      %18 = arith.minimumf %17, %16 : vector<8x32xf32>
      %c0_8 = arith.constant 0 : index
      %c0_9 = arith.constant 0 : index
      %19 = vector.load %arg8[%c0_8, %c0_9] : memref<8x32xf32, #tpu.memory_space<vmem>>, vector<8x32xf32>
      tpu.vector_store %arg8[%c0_8, %c0_9], %18 {strides = array<i32>} : memref<8x32xf32, #tpu.memory_space<vmem>>, vector<8x32xf32>,
    } else {
    }
    return
  }
  func.func @transform_0(%arg0: i32, %arg1: i32) -> (i32, i32) {
    %c1_i32 = arith.constant 1 : i32
    %0 = arith.subi %c1_i32, %arg0 : i32
    %1 = arith.muli %arg1, %0 : i32
    %c0_i32 = arith.constant 0 : i32
    %c0_i32_0 = arith.constant 0 : i32
    return %1, %c0_i32 : i32, i32
  }
  func.func @transform_1(%arg0: i32, %arg1: i32) -> (i32, i32) {
    %c1_i32 = arith.constant 1 : i32
    %0 = arith.subi %c1_i32, %arg0 : i32
    %1 = arith.muli %arg1, %0 : i32
    %c0_i32 = arith.constant 0 : i32
    %c0_i32_0 = arith.constant 0 : i32
    return %1, %c0_i32 : i32, i32
  }
  func.func @transform_2(%arg0: i32, %arg1: i32) -> (i32, i32) {
    %c0_i32 = arith.constant 0 : i32
    %c0_i32_0 = arith.constant 0 : i32
    %c0_i32_1 = arith.constant 0 : i32
    return %c0_i32, %c0_i32_0 : i32, i32
  }
  func.func @transform_3(%arg0: i32, %arg1: i32) -> (i32, i32) {
    %c0_i32 = arith.constant 0 : i32
    %c0_i32_0 = arith.constant 0 : i32
    %c0_i32_1 = arith.constant 0 : i32
    return %c0_i32, %c0_i32_0 : i32, i32
  }
  func.func @transform_4(%arg0: i32, %arg1: i32) -> (i32, i32) {
    %c0_i32 = arith.constant 0 : i32
    %c0_i32_0 = arith.constant 0 : i32
    %c0_i32_1 = arith.constant 0 : i32
    return %c0_i32, %c0_i32_0 : i32, i32
  }
  func.func @transform_5(%arg0: i32, %arg1: i32) -> (i32, i32) {
    %c0_i32 = arith.constant 0 : i32
    %c0_i32_0 = arith.constant 0 : i32
    %c0_i32_1 = arith.constant 0 : i32
    return %c0_i32, %c0_i32_0 : i32, i32
  }
  func.func @transform_6(%arg0: i32, %arg1: i32) -> (i32, i32) {
    %0 = arith.muli %arg1, %arg0 : i32
    %c0_i32 = arith.constant 0 : i32
    %c0_i32_0 = arith.constant 0 : i32
    return %0, %c0_i32 : i32, i32
  }
  func.func @transform_7(%arg0: i32, %arg1: i32) -> (i32, i32) {
    %c0_i32 = arith.constant 0 : i32
    %c0_i32_0 = arith.constant 0 : i32
    %c0_i32_1 = arith.constant 0 : i32
    return %c0_i32, %c0_i32_0 : i32, i32
  }
  func.func @transform_8(%arg0: i32, %arg1: i32) -> (i32, i32) {
    %c0_i32 = arith.constant 0 : i32
    %c0_i32_0 = arith.constant 0 : i32
    %c0_i32_1 = arith.constant 0 : i32
    return %c0_i32, %c0_i32_0 : i32, i32
  }
  func.func @transform_9(%arg0: i32, %arg1: i32) -> (i32, i32) {
    %c0_i32 = arith.constant 0 : i32
    %c0_i32_0 = arith.constant 0 : i32
    %c0_i32_1 = arith.constant 0 : i32
    return %c0_i32, %c0_i32_0 : i32, i32
  }
}

</mosaic_0001>

<bundles_post_ra>
// kernel: _running_norm_step.1
= control target key start
LH: loop header
LB: loop body
LE: loop exit
PB: predicated region body
PF: predicated region fallthrough
CT: control target
= control target key end

     0   :  { %s1486_s0 = inlined_call_operand.vmem [shape: f32[20,32], index: 0, kind: input, shape index: {}]   ;;  %s1487_s1 = inlined_call_operand.vmem [shape: f32[20,1], index: 1, kind: input, shape index: {}]   ;;  %s1488_s2 = inlined_call_operand.<no memory space> [shape: f32[1,1], index: 2, kind: input, shape index: {}]   ;;  %s1489_s4 = inlined_call_operand.vmem [shape: f32[1,32], index: 4, kind: input, shape index: {}]   ;;  %s1490_s5 = inlined_call_operand.vmem [shape: f32[1,32], index: 5, kind: input, shape index: {}]   ;;  %s1491_s6 = inlined_call_operand.hbm [shape: f32[20,32], index: 6, kind: output, shape index: {0}]   ;;  %s1492_s7 = inlined_call_operand.hbm [shape: f32[1,1], index: 7, kind: output, shape index: {1}]   ;;  %s1493_s8 = inlined_call_operand.hbm [shape: f32[1,32], index: 8, kind: output, shape index: {2}]   ;;  %s1494_s9 = inlined_call_operand.hbm [shape: f32[1,32], index: 9, kind: output, shape index: {3}]   ;;  %s1495_s3 = inlined_call_operand.<no memory space> [shape: f32[1,1], index: 3, kind: input, shape index: {}]  }
   0x1   :  { %1499 = sst [smem:[#allocation22_spill]] %s1486_s0  ;;  %v15_v0 = vstv %s1488_s2  ;;  %v17_v1 = vstv %s1495_s3 }
   0x2   :  { %16 = vst [vmem:[#allocation7] sm:$0x1] %v15_v0  ;;  %18 = vst [vmem:[#allocation8] sm:$0x1] %v17_v1 }
   0x3   :  { %19 = vsyncpa [#allocation10], 0 }
   0x4   :  { %21 = vsyncpa [#allocation10 + $0x1], 0 }
   0x5   :  { %22 = vsyncpa [#allocation12], 0 }
   0x6   :  { %23 = vsyncpa [#allocation15], 0  ;;  %s1283_s13 = smov 0   ;;  %s1285_s14 = smov 0  }
   0x7   :  { %s1287_s15 = smov 0   ;;  %s1289_s16 = smov 0  }
   0x8   :  { %s1291_s17 = smov 0   ;;  %s1293_s2 = smov 0  }
   0x9   :  { %s1295_s18 = smov 0   ;;  %s1297_s3 = smov 0  }
   0xa LB: > { %1500 = sst [smem:[#allocation19_spill]] %s1212_s18  ;;  %s890_s19 = sadd.s32 4294967295, %s1216_s3   ;;  %s1216_s3 = sphi %s1297_s3, %s29_s3   ;;  %s1212_s18 = sphi %s1295_s18, %s1510_s18   ;;  %s1208_s2 = sphi %s1293_s2, %s1515_s2   ;;  %s1204_s17 = sphi %s1291_s17, %s1508_s17   ;;  %s1200_s16 = sphi %s1289_s16, %s1514_s16   ;;  %s1196_s15 = sphi %s1287_s15, %s1513_s15   ;;  %s1192_s14 = sphi %s1285_s14, %s1512_s14   ;;  %s1188_s13 = sphi %s1283_s13, %s1511_s13  }
   0xb   : > { %s891_s20 = sadd.s32 4294967294, %s1216_s3   ;;  %s38_s21 = sadd.s32 1, %s1208_s2 }
   0xc   : > { %p39_p0 = scmp.ge.s32.totalorder %s38_s21, 3  ;;  %s41_s22 = sadd.s32 1, %s1212_s18 }
   0xd   : > { %s189_s23 = smul.u32 %s1208_s2, %s1212_s18  ;;  %p204_p1 = scmp.ne.s32.totalorder %s1196_s15, %s1192_s14 }
   0xe   : > { %s1517_s21 = smov (%p39_p0, %s38_s21), 0  ;;  %s1519_s22 = smov (!%p39_p0, %s41_s22), %s1212_s18 }
   0xf   : > { %1501 = sst [smem:[#allocation20_spill]] %s1517_s21  ;;  %p1334_p2 = scmp.eq.s32.totalorder %s890_s19, 5 }
  0x10   : > { %p210_p3 = scmp.ne.s32.totalorder %s1192_s14, %s1188_s13  ;;  %p43_p4 = scmp.ge.s32.totalorder %s1519_s22, 2 }
  0x11   : > { %p211_p5 = scmp.eq.s32.totalorder %s891_s20, 5  ;;  %p1342_p6 = por %p1334_p2, %p204_p1 }
  0x12   : > { %p894_p7 = scmp.ge.s32.totalorder %s1216_s3, 1  ;;  %s1521_s22 = smov (%p43_p4, %s1519_s22), 0 }
  0x13   : > { %1504 = sst [smem:[#allocation21_spill]] %s1521_s22  ;;  %p1349_p8 = por %p211_p5, %p210_p3 }
  0x14   : > { %p326_p9 = scmp.lt.s32.totalorder %s1216_s3, 7  ;;  %s190_s27 = smul.u32 %s1521_s22, %s1517_s21 }
  0x15   : > { %s1505_s26 = scalar_select %p1349_p8, 1, 0 }
  0x16   : > { %p327_p10 = pnand %p894_p7, %p326_p9  ;;  %s191_s28 = ssub.s32 %s189_s23, %s190_s27 }
  0x17   : > { %s194_s29 = sadd.s32 1, %s1196_s15  ;;  %p192_p11 = scmp.eq.s32.totalorder %s191_s28, 0 }
  0x18   : > { %330 = sbr.rel (%p327_p10) target bundleno = 635 (0x27b), region = 44  ;;  %s360_s10 = sand.u32 (!%p327_p10), 1, %s1192_s14  }
  0x19   : > { %s1358_s30 = scalar_select %p192_p11, %s1196_s15, %s194_s29  }
  0x1a   : > { %s369_s11 = ssub.s32 (!%p327_p10), 1, %s1204_s17  ;;  %s1364_s12 = sshll.u32 (!%p327_p10), %s360_s10, 3 }
  0x1b   : > { %s370_s19 = smul.u32 (!%p327_p10), %s1200_s16, %s369_s11  ;;  %s1506_s0 = sld [smem:[#allocation22_spill]] (!%p327_p10) }
  0x1c   : > { %s362_s18 = scalar_lea.vmem (!%p327_p10), [#allocation9], %s1364_s12  ;;  %p898_p13 = scmp.ne.s32.totalorder (!%p327_p10), %s1204_s17, 0 }
  0x1d   : > { %p371_p12 = scmp.lt.s32.totalorder %s370_s19, 2  ;;  %p899_p0 = scmp.ne.s32.totalorder (!%p898_p13), %s1200_s16, 0 }
  0x1e   : > { %389 = sbr.rel (%p898_p13) target bundleno = 556 (0x22c), region = 48 }
  0x1f   : > { %s1523_s19 = smov (!%p371_p12, %s370_s19), 2 }
  0x20   : > { %s896_s20 = sshll.u32 %s1523_s19, 3 }
  0x21   : > { %s1370_s28 = scalar_lea.vmem %s1506_s0, %s896_s20  ;;  %s382_s21 = scalar_lea.vmem %s1487_s1, %s896_s20 }
  0x23   : > { %393 = sbr.rel (%p899_p0) target bundleno = 42 (0x2a), region = 52 }
  0x28   : > { %vm394_vm0 = vcmask 261120   ;;  %v1218_v2 = vmov 0.0  }
  0x29   : > { %395 = vst.msk [vmem:[#allocation3] sm:$0xff] %vm394_vm0, %v1218_v2  ;;  %396 = vst.msk [vmem:[#allocation4] sm:$0xff] %vm394_vm0, %v1218_v2 }
  0x2a PF: > { %s900_s11 = sshll.u32 %s1200_s16, 3  ;;  %v411_v3 = vlaneseq  ;;  %v1219_v4 = vmov 0   ;;  %v416_v9 = vld [vmem:[%s382_s21] sm:$0xff]  ;;  %v1220_v11 = vmov 0.0   ;;  %vm1221_vm4 = vmmov 0   ;;  %p905_p1 = scmp.ne.s32.totalorder %s1200_s16, 2 }
  0x2b   : > { %1033 = vset.pattern.permute.xlu0 %v1219_v4  ;;  %v413_v5 = vstv %s900_s11  ;;  %926 = vmatprep.subr.mxu0 %v1220_v11  ;;  %v402_v15 = vld [vmem:[%s1370_s28] sm:$0xff]  ;;  %vm400_vm5 = vcmask 261120   ;;  %s399_s22 = scalar_lea.vmem [#allocation2], %s900_s11  ;;  %vm431_vm6 = vcmask 64512  }
  0x2c   : > { %v1379_v6 = vshrl.u32 %v411_v3, 7  ;;  %v426_v7 = vand.u32 127, %v411_v3  ;;  %931 = vmatprep.subr.mxu1 %v1220_v11  ;;  %928 = vmatprep.mubr.msk.f32.mxu0 %vm1221_vm4, %v1220_v11  ;;  %401 = vst.msk [vmem:[%s399_s22] sm:$0xff] %vm400_vm5, %v402_v15  ;;  %v901_v16 = vld [vmem:[%s1489_s4] ss:$0 sm:$0xff] }
  0x2d   : > { %933 = vmatprep.mubr.msk.f32.mxu1 %vm1221_vm4, %v1220_v11  ;;  %v410_v17 = vsub.f32 %v402_v15, %v901_v16 }
  0x2e   : > { %v414_v8 = vadd.s32 %v413_v5, %v1379_v6  ;;  %v427_v10 = vand.u32 7, %v426_v7 }
  0x30   : > { %vm415_vm1 = vcmp.lt.s32.totalorder %v414_v8, 20  ;;  %vm428_vm2 = vcmp.eq.s32.totalorder %v427_v10, %v1379_v6  ;;  %v430_v21 = vld [vmem:[#allocation3] sm:$0xff]  ;;  %v507_v24 = vld [vmem:[#allocation4] sm:$0xff] }
  0x31   : > { %v417_v12 = vsel %vm415_vm1, %v416_v9, 0.0  ;;  %v429_v13 = vsel %vm428_vm2, 1.0, %v1220_v11 }
  0x32   : > { %vm418_vm3 = vcmp.gt.f32.partialorder %v417_v12, 0.0 }
  0x33   : > { %v419_v14 = vsel %vm418_vm3, 1, %v1219_v4 }
  0x34   : > { %421 = vperm.xlu0 %1033, %v419_v14  }
  0xaf   : > { %v422_v18 = vpop.permute.xlu0 %421 }
  0xb0   : > { %vm423_vm7 = vcmp.eq.s32.totalorder %v422_v18, 1 }
  0xb1   : > { %v424_v19 = vsel %vm423_vm7, %v410_v17, 0.0  ;;  %927 = vmatpush3.msk.msra.mxu0 %vm423_vm7, %v410_v17 }
  0xb2   : > { %v508_v20 = vmul.f32 %v424_v19, %v424_v19  ;;  %929 = vmatmul.mubr.msk.f32.vlgmr.msra.gmra.mxu0 %vm431_vm6, %v429_v13 }
  0xb4   : > { %932 = vmatpush3.msra.mxu1 %v508_v20 }
  0xb5   : > { %934 = vmatmul.mubr.msk.f32.vlgmr.msra.gmra.mxu1 %vm431_vm6, %v429_v13 }
 0x172   : > { %v501_v22 = vpop.f32.mrf.mxu0 }
 0x173   : > { %v505_v23 = vadd.f32 %v501_v22, %v430_v21 }
 0x174   : > { %v930_v25 = vpop.f32.mrf.mxu0  ;;  %584 = sbr.rel (%p905_p1) target bundleno = 556 (0x22c), region = 56 }
 0x175   : > { %506 = vst.msk [vmem:[#allocation3] sm:$0xff] %vm400_vm5, %v505_v23  ;;  %v575_v26 = vpop.f32.mrf.mxu1 }
 0x176   : > { %v579_v27 = vadd.f32 %v575_v26, %v507_v24 }
 0x177   : > { %v935_v28 = vpop.f32.mrf.mxu1 }
 0x178   : > { %580 = vst.msk [vmem:[#allocation4] sm:$0xff] %vm400_vm5, %v579_v27 }
 0x179   : > { %v602_v29 = vld [vmem:[#allocation8] sm:$0x1]  ;;  %v601_v30 = vld [vmem:[#allocation7] sm:$0x1]  ;;  %v1222_v31 = vmov 0   ;;  %vm688_vm8 = vcmask 0  }
 0x17a   : > { %1034 = vset.pattern.permute.xlu0 %v1222_v31  ;;  %v605_v32 = vmax.f32 %v602_v29, 1.0  ;;  %1035 = vset.pattern.permute.xlu1 %v1222_v31  ;;  %v906_v33 = vadd.f32 -1.0, %v602_v29  ;;  %v633_v34 = vadd.f32 %v602_v29, %v601_v30  ;;  %vm675_vm9 = vcmp.gt.f32.partialorder %v602_v29, 0.0  ;;  %v603_v9 = vld [vmem:[%s1489_s4] sm:$0x1] }
 0x17b   : > { %v676_v38 = vsel %vm675_vm9, 1, %v1222_v31  ;;  %v613_v44 = vsub.s32 0, %v1379_v6  ;;  %vm690_vm10 = vcmask 253952   ;;  %v604_v17 = vld [vmem:[%s1490_s5] sm:$0x1] }
 0x17c   : > { %608 = vperm.xlu0 %1034, %v605_v32   ;;  %v621_v35 = vmax.f32 %v906_v33, 1.0  ;;  %v634_v36 = vmax.f32 %v633_v34, 1.0  ;;  %v687_v37 = vsel %vm675_vm9, %v633_v34, %v601_v30  ;;  %v585_v39 = vld [vmem:[#allocation3] sm:$0xff] }
 0x17d   : > { %689 = vst.msk [vmem:[#allocation11] sm:$0x1] %vm688_vm8, %v687_v37  ;;  %v586_v40 = vsel %vm400_vm5, %v585_v39, 0.0 }
 0x17e   : > { %647 = vperm.xlu1 %1035, %v634_v36   ;;  %v587_v42 = vrot.slane %v586_v40, 4 }
 0x17f   : > { %v593_v41 = vld [vmem:[#allocation4] sm:$0xff] }
 0x180   : > { %624 = vperm.xlu0 %1034, %v621_v35   ;;  %v594_v43 = vsel %vm400_vm5, %v593_v41, 0.0  ;;  %v588_v45 = vadd.f32 %v587_v42, %v586_v40 }
 0x181   : > { %v595_v46 = vrot.slane %v594_v43, 4 }
 0x182   : > { %659 = vperm.xlu1 %1035, %v601_v30   ;;  %v589_v48 = vrot.slane %v588_v45, 2 }
 0x183   : > { %v596_v50 = vadd.f32 %v595_v46, %v594_v43 }
 0x184   : > { %637 = vperm.xlu0 %1034, %v602_v29   ;;  %v590_v54 = vadd.f32 %v589_v48, %v588_v45 }
 0x185   : > { %v597_v55 = vrot.slane %v596_v50, 2 }
 0x186   : > { %678 = vperm.xlu1 %1035, %v676_v38   ;;  %v591_v57 = vrot.slane %v590_v54, 1 }
 0x187   : > { %v598_v58 = vadd.f32 %v597_v55, %v596_v50 }
 0x188   : > { %v592_v60 = vadd.f32 %v591_v57, %v590_v54 }
 0x189   : > { %v599_v61 = vrot.slane %v598_v58, 1 }
 0x18b   : > { %v600_v4 = vadd.f32 %v599_v61, %v598_v58 }
 0x1f7   : > { %v609_v47 = vpop.permute.xlu0 %608 }
 0x1f8   : > { %v614_v49 = vrot.slane %v609_v47, %v613_v44 }
 0x1f9   : > { %v648_v51 = vpop.permute.xlu1 %647 }
 0x1fa   : > { %1036 = vrcp.f32 %v614_v49  ;;  %v653_v52 = vrot.slane %v648_v51, %v613_v44 }
 0x1fb   : > { %v625_v53 = vpop.permute.xlu0 %624 }
 0x1fc   : > { %1038 = vrcp.f32 %v653_v52  ;;  %v630_v56 = vrot.slane %v625_v53, %v613_v44 }
 0x1fd   : > { %v660_v59 = vpop.permute.xlu1 %659 }
 0x1fe   : > { %1040 = vrcp.f32 %v630_v56  ;;  %v665_v7 = vrot.slane %v660_v59, %v613_v44 }
 0x1ff   : > { %v638_v62 = vpop.permute.xlu0 %637 }
 0x200   : > { %v643_v1 = vrot.slane %v638_v62, %v613_v44  ;;  %v666_v22 = vmul.f32 %v665_v7, %v604_v17 }
 0x201   : > { %v679_v2 = vpop.permute.xlu1 %678 }
 0x202   : > { %v683_v10 = vrot.slane %v679_v2, %v613_v44 }
 0x204   : > { %vm684_vm11 = vcmp.eq.s32.totalorder %v683_v10, 1 }
 0x207   : > { %v1037_v63 = vpop.eup %1036 }
 0x208   : > { %v616_v0 = vmul.f32 %v1037_v63, %v592_v60 }
 0x209   : > { %v1039_v3 = vpop.eup %1038 }
 0x20a   : > { %v617_v5 = vmul.f32 %v616_v0, %v614_v49  ;;  %v644_v6 = vmul.f32 %v643_v1, %v616_v0  ;;  %v669_v8 = vmul.f32 %v616_v0, %v616_v0 }
 0x20b   : > { %v1041_v16 = vpop.eup %1040 }
 0x20c   : > { %v618_v11 = vmul.f32 %v617_v5, %v616_v0  ;;  %v655_v12 = vmul.f32 %v1039_v3, %v644_v6  ;;  %v670_v13 = vmul.f32 %v669_v8, %v665_v7 }
 0x20e   : > { %v619_v14 = vsub.f32 %v600_v4, %v618_v11  ;;  %v656_v15 = vadd.f32 %v655_v12, %v603_v9  ;;  %v671_v19 = vmul.f32 %v670_v13, %v643_v1 }
 0x210   : > { %v632_v18 = vmul.f32 %v1041_v16, %v619_v14  ;;  %v685_v20 = vsel %vm684_vm11, %v656_v15, %v603_v9  ;;  %v672_v24 = vmul.f32 %v1039_v3, %v671_v19 }
 0x211   : > { %691 = vst.msk [vmem:[#allocation13] sm:$0x1] %vm690_vm10, %v685_v20  ;;  %693 = vst.msk [vmem:[#allocation5] sm:$0x1] %vm690_vm10, %v685_v20 }
 0x212   : > { %v667_v21 = vmul.f32 %v643_v1, %v632_v18 }
 0x214   : > { %v668_v23 = vadd.f32 %v667_v21, %v666_v22 }
 0x216   : > { %v673_v25 = vadd.f32 %v672_v24, %v668_v23 }
 0x218   : > { %v674_v26 = vmul.f32 %v1039_v3, %v673_v25 }
 0x21a   : > { %v686_v27 = vsel %vm684_vm11, %v674_v26, %v604_v17 }
 0x21b   : > { %692 = vst.msk [vmem:[#allocation14] sm:$0x1] %vm690_vm10, %v686_v27  ;;  %v694_v28 = vadd.f32 1e-08, %v686_v27 }
 0x21d   : > { %1042 = vrsqrt.f32 %v694_v28 }
 0x22a   : > { %v1043_v29 = vpop.eup %1042 }
 0x22b   : > { %696 = vst.msk [vmem:[#allocation6] sm:$0x1] %vm690_vm10, %v1043_v29 }
 0x22c PF: > { %p907_p3 = scmp.ne.s32.totalorder %s1204_s17, 1 }
 0x22d   : > { %s908_s29 = sshll.u32 (!%p907_p3), %s1200_s16, 3 }
 0x22e   : > { %700 = sbr.rel (%p907_p3) target bundleno = 571 (0x23b), region = 60  ;;  %s702_s11 = scalar_lea.vmem (!%p907_p3), [#allocation2], %s908_s29 }
 0x233   : > { %v909_v30 = vld [vmem:[#allocation5] ss:$0 sm:$0xff]  ;;  %v703_v31 = vld [vmem:[%s702_s11] sm:$0xff]  ;;  %v910_v32 = vld [vmem:[#allocation6] ss:$0 sm:$0xff]  ;;  %vm722_vm12 = vcmask 261120  }
 0x234   : > { %v711_v33 = vsub.f32 %v703_v31, %v909_v30 }
 0x236   : > { %v719_v34 = vmul.f32 %v910_v32, %v711_v33 }
 0x238   : > { %v911_v35 = vclamps-f32 %v719_v34, 10.0 }
 0x23a   : > { %723 = vst.msk [vmem:[%s362_s18] sm:$0xff] %vm722_vm12, %v911_v35 }
 0x23b PF: > { %s1223_s22 = smov [#allocation11]   ;;  %s732_s19 = smul.u32 %s1200_s16, %s1204_s17 }
 0x23c   : > { %s750_s21 = sshll.u32 %s1223_s22, 4  ;;  %s751_s21 = int_to_ptr.vmem [resolvable:$true] %s750_s21 }
 0x23d   : > { %s1044_s20 = scalar_lea.vmem %s751_s21, 16  ;;  %s1050_s23 = scalar_lea.vmem %s751_s21, 32 }
 0x23e   : > { %p1045_p4 = scmp.ne.s32.totalorder %s751_s21, %s1044_s20  ;;  %p1051_p9 = scmp.lt.s32.totalorder %s751_s21, %s751_s21 }
 0x23f   : > { %p1052_p10 = scmp.lt.s32.totalorder %s1050_s23, %s1044_s20 }
 0x240   : > { %p1046_p5 = pnand %p1045_p4, %p1334_p2 }
 0x241   : > { %p1053_p11 = por %p1052_p10, %p1051_p9 }
 0x242   : > { %p1047_p7 = pneg %p1046_p5 }
 0x244   : > { %p1054_p12 = pnand %p1053_p11, %p1047_p7 }
 0x246   : > { %1057 = shalt.err (!%p1054_p12)
}
 0x247   : > { %938 = dma.vmem_to_hbm [thread:$0]  (%p1334_p2), %s751_s21, 16, %s1492_s7, [#allocation12]  }
 0x248   : > { %s913_s16 = sshll.u32 %s732_s19, 7  ;;  %s739_s17 = sshll.u32 %s362_s18, 4  ;;  %s740_s17 = int_to_ptr.vmem [resolvable:$true] %s739_s17 }
 0x249   : > { %s737_s22 = scalar_lea.hbm %s1491_s6, %s913_s16  ;;  %s725_s20 = scalar_lea.sflag [#allocation10], %s360_s10 }
 0x24a   : > { %s1068_s23 = scalar_lea.vmem %s740_s17, 128  ;;  %s1224_s27 = smov [#allocation9]  }
 0x24b   : > { %p1069_p13 = scmp.ne.s32.totalorder %s740_s17, %s1068_s23  ;;  %s1072_s28 = sshll.u32 %s1224_s27, 4  ;;  %s1073_s28 = int_to_ptr.vmem [resolvable:$false] %s1072_s28 }
 0x24c   : > { %s1074_s0 = scalar_lea.vmem %s1073_s28, 256  ;;  %p1075_p3 = scmp.lt.s32.totalorder %s740_s17, %s1073_s28 }
 0x24d   : > { %p1070_p0 = pnand %p1069_p13, %p1342_p6  ;;  %p1076_p4 = scmp.lt.s32.totalorder %s1074_s0, %s1068_s23 }
 0x24f   : > { %p1071_p1 = pneg %p1070_p0  ;;  %p1077_p5 = por %p1076_p4, %p1075_p3 }
 0x251   : > { %p1078_p7 = pnand %p1077_p5, %p1071_p1 }
 0x253   : > { %1081 = shalt.err (!%p1078_p7)
}
 0x254   : > { %s1082_s18 = scalar_lea.hbm %s737_s22, 128  ;;  %s1086_s21 = scalar_lea.hbm %s1491_s6, 384 }
 0x255   : > { %p1083_p9 = scmp.ne.s32.totalorder %s737_s22, %s1082_s18  ;;  %p1087_p12 = scmp.lt.s32.totalorder %s737_s22, %s1491_s6 }
 0x256   : > { %p1088_p13 = scmp.lt.s32.totalorder %s1086_s21, %s1082_s18 }
 0x257   : > { %p1084_p10 = pnand %p1083_p9, %p1342_p6 }
 0x258   : > { %p1089_p0 = por %p1088_p13, %p1087_p12 }
 0x259   : > { %p1085_p11 = pneg %p1084_p10 }
 0x25b   : > { %p1090_p8 = pnand %p1089_p0, %p1085_p11 }
 0x25d   : > { %1093 = shalt.err (!%p1090_p8)
}
 0x25e   : > { %936 = dma.vmem_to_hbm [thread:$0]  (%p1342_p6), %s740_s17, 128, %s737_s22, %s725_s20  }
 0x25f   : > { %s1225_s0 = smov [#allocation13]   ;;  %s1226_s11 = smov [#allocation14]  }
 0x260   : > { %s761_s29 = sshll.u32 %s1225_s0, 4  ;;  %s772_s23 = sshll.u32 %s1226_s11, 4  ;;  %s762_s29 = int_to_ptr.vmem [resolvable:$true] %s761_s29  ;;  %s773_s23 = int_to_ptr.vmem [resolvable:$true] %s772_s23 }
 0x261   : > { %s1094_s27 = scalar_lea.vmem %s762_s29, 16  ;;  %s1100_s28 = scalar_lea.vmem %s762_s29, 32 }
 0x262   : > { %p1095_p1 = scmp.ne.s32.totalorder %s762_s29, %s1094_s27  ;;  %p1101_p5 = scmp.lt.s32.totalorder %s762_s29, %s762_s29 }
 0x263   : > { %p1102_p7 = scmp.lt.s32.totalorder %s1100_s28, %s1094_s27 }
 0x264   : > { %p1096_p3 = pnand %p1095_p1, %p1334_p2 }
 0x265   : > { %p1103_p9 = por %p1102_p7, %p1101_p5 }
 0x266   : > { %p1097_p4 = pneg %p1096_p3 }
 0x268   : > { %p1104_p8 = pnand %p1103_p9, %p1097_p4 }
 0x26a   : > { %1107 = shalt.err (!%p1104_p8)
}
 0x26b   : > { %940 = dma.vmem_to_hbm [thread:$0]  (%p1334_p2), %s762_s29, 16, %s1493_s8, [#allocation12]  }
 0x26c   : > { %s1118_s22 = scalar_lea.vmem %s773_s23, 16  ;;  %s1124_s20 = scalar_lea.vmem %s773_s23, 32 }
 0x26d   : > { %p1119_p6 = scmp.ne.s32.totalorder %s773_s23, %s1118_s22  ;;  %p1125_p12 = scmp.lt.s32.totalorder %s773_s23, %s773_s23 }
 0x26e   : > { %p1126_p13 = scmp.lt.s32.totalorder %s1124_s20, %s1118_s22 }
 0x26f   : > { %p1120_p10 = pnand %p1119_p6, %p1334_p2 }
 0x270   : > { %p1127_p0 = por %p1126_p13, %p1125_p12 }
 0x271   : > { %p1121_p11 = pneg %p1120_p10 }
 0x273   : > { %p1128_p1 = pnand %p1127_p0, %p1121_p11 }
 0x275   : > { %1131 = shalt.err (!%p1128_p1)
}
 0x276   : > { %942 = dma.vmem_to_hbm [thread:$0]  (%p1334_p2), %s773_s23, 16, %s1494_s9, [#allocation15]  }
 0x277   : > { %1175 = dma.done.wait (%p1334_p2), [#allocation12], 32  }
 0x278   : > { %1177 = vsyncadd (%p1334_p2), [#allocation12], 4294967264 }
 0x279   : > { %1179 = dma.done.wait (%p1334_p2), [#allocation15], 16  }
 0x27a   : > { %1181 = vsyncadd (%p1334_p2), [#allocation15], 4294967280 }
 0x27b PF: > { %p960_p3 = scmp.ge.s32.totalorder %s1216_s3, 2  ;;  %s796_s12 = sand.u32 1, %s1188_s13  }
 0x27c   : > { %p1507_p4 = scmp.ne.s32.totalorder %s1505_s26, 0  ;;  %s797_s21 = scalar_lea.sflag [#allocation10], %s796_s12 }
 0x27e   : > { %p951_p5 = pnand %p960_p3, %p1507_p4 }
 0x280   : > { %p952_p7 = pneg %p951_p5 }
 0x282   : > { %1183 = dma.done.wait (%p952_p7), %s797_s21, 128  }
 0x283   : > { %1185 = vsyncadd (%p952_p7), %s797_s21, 4294967168  ;;  %s29_s3 = sadd.s32 1, %s1216_s3   ;;  %s1508_s17 = sld [smem:[#allocation19_spill]] }
 0x284   : > { %p26_p9 = scmp.ge.s32.totalorder %s29_s3, 8   ;;  %s1509_s24 = sld [smem:[#allocation20_spill]] }
 0x285   : > { %s1510_s18 = sld [smem:[#allocation21_spill]]  ;;  %s1511_s13 = smov %s1192_s14 }
 0x286   : > { %s1512_s14 = smov %s1196_s15  ;;  %s1513_s15 = smov %s1358_s30 }
 0x287   : > { %s1514_s16 = smov %s1208_s2  ;;  %28 = sbr.rel (!%p26_p9) target bundleno = 10 (0xa), region = 124 }
 0x28a   : > { %s1515_s2 = smov %s1509_s24 }
 0x28c   :  { %802 = vsyncpa [#allocation10], 1 }
 0x28d   :  { %804 = vsyncpa [#allocation10 + $0x1], 1 }
 0x28e   :  { %805 = vsyncpa [#allocation12], 1 }
 0x28f   :  { %806 = vsyncpa [#allocation15], 1 }

</bundles_post_ra>
